<compile_context>
chip_gen: v7x
topology: tpu7x:2x2x1
jax: 0.10.0
libtpu: 0.0.40
codegen_flags: <defaults>
</compile_context>

<pallas_src>
import jax
import jax.numpy as jnp
from jax.experimental import pallas as pl
from jax.experimental.pallas import tpu as pltpu

INPUT_NEURONS = 25
FEAT_PAD = 32            # input features zero-padded 25 -> 32 (sublane friendly)
NEURONS_PER_LAYER = 64
OUTPUT_NEURONS = 1
HIDDEN_LAYERS = 4
DROPOUT = 0.3            # identity at inference time
MAX_TILE_B = 1024        # cap on batch tile (lanes); multiple of 128


def _mlp_kernel(x_ref,
                w0_ref, b0_ref,
                w1_ref, b1_ref,
                w2_ref, b2_ref,
                w3_ref, b3_ref,
                w4_ref, b4_ref,
                w5_ref, b5_ref,
                o_ref):
    """Forward for one batch tile in transposed layout [features, batch].

    Batch sits on lanes, so the x DMA and the 1-row output store are lane-dense.
    Weight refs for matmuls are bf16 (MXU operands); accumulation / bias / ReLU
    stay f32.
    """
    xT = x_ref[...]                                              # (FEAT_PAD, TILE_B) bf16

    # Input layer: Linear(25->64) + ReLU   (W stored PyTorch-style (out, in), zero-padded)
    h = jnp.dot(w0_ref[...], xT, preferred_element_type=jnp.float32) + b0_ref[...]
    h = jnp.maximum(h, 0.0)

    # 4 hidden layers: Linear(64->64) + ReLU (+ Dropout == identity in eval)
    for w_ref, b_ref in ((w1_ref, b1_ref), (w2_ref, b2_ref),
                         (w3_ref, b3_ref), (w4_ref, b4_ref)):
        h = jnp.dot(w_ref[...], h.astype(w_ref.dtype),
                    preferred_element_type=jnp.float32) + b_ref[...]
        h = jnp.maximum(h, 0.0)
        # TODO(synk): training-mode nn.Dropout(p=0.3) would need pltpu.prng_seed +
        #             pltpu.prng_random_bits masking; eval semantics => identity here.

    # Output layer Linear(64->1) as VPU multiply + sublane reduce (XLU):
    # avoids an M=1 MXU matmul and keeps the (1, TILE_B) result lane-dense.
    out = jnp.sum(h * w5_ref[...], axis=0, keepdims=True) + b5_ref[...]   # (1, TILE_B)
    o_ref[...] = out.astype(o_ref.dtype)


def init_params(key):
    """PyTorch-style shapes: W (out, in), b (out,), f32, uniform(-1/sqrt(fan_in), +)."""
    dims = [INPUT_NEURONS] + [NEURONS_PER_LAYER] * (HIDDEN_LAYERS + 1) + [OUTPUT_NEURONS]
    params = []
    for i in range(len(dims) - 1):
        fan_in, fan_out = dims[i], dims[i + 1]
        key, kw, kb = jax.random.split(key, 3)
        bound = float(fan_in) ** -0.5
        w = jax.random.uniform(kw, (fan_out, fan_in), jnp.float32, -bound, bound)
        b = jax.random.uniform(kb, (fan_out,), jnp.float32, -bound, bound)
        params.append((w, b))
    return params


def _prep_params(params):
    """Pad W0 to 32 inputs, cast matmul weights to bf16, reshape biases to columns."""
    flat = []
    n = len(params)
    for i, (w, b) in enumerate(params):
        if i == 0:
            w = jnp.pad(w, ((0, 0), (0, FEAT_PAD - INPUT_NEURONS)))        # (64, 32)
        if i < n - 1:
            flat.append(w.astype(jnp.bfloat16))                            # MXU operand
            flat.append(b.reshape(-1, 1).astype(jnp.float32))              # (64, 1)
        else:
            flat.append(w.reshape(-1, 1).astype(jnp.float32))              # (64, 1) for VPU reduce
            flat.append(b.reshape(1, 1).astype(jnp.float32))               # (1, 1)
    return flat


@jax.jit
def net_forward(x, params):
    x2d = x.reshape(-1, INPUT_NEURONS).astype(jnp.float32)   # x.view(-1, 25)
    batch = x2d.shape[0]

    # Adaptive batch tile: multiple of 128, capped, so small batches don't
    # pad out to a huge tile while large batches still amortize per-step cost.
    tile_b = min(MAX_TILE_B, max(128, 128 * ((batch + 127) // 128)))
    num_tiles = pl.cdiv(batch, tile_b)
    batch_padded = num_tiles * tile_b

    # Zero-pad features 25->32 and batch -> multiple of tile_b, then transpose
    # so batch lands on lanes; cast the matmul operand to bf16 (halves HBM traffic).
    xp = jnp.pad(x2d, ((0, batch_padded - batch), (0, FEAT_PAD - INPUT_NEURONS)))
    xT = xp.T.astype(jnp.bfloat16)                           # (FEAT_PAD, batch_padded)

    flat_params = _prep_params(params)

    def resident(shape):
        # Constant block index -> DMA'd once, VMEM-resident across the grid.
        return pl.BlockSpec(shape, lambda i: (0, 0))

    param_specs = [resident(p.shape) for p in flat_params]

    out = pl.pallas_call(
        _mlp_kernel,
        grid=(num_tiles,),
        out_shape=jax.ShapeDtypeStruct((1, batch_padded), jnp.float32),
        in_specs=[pl.BlockSpec((FEAT_PAD, tile_b), lambda i: (0, i))] + param_specs,
        out_specs=pl.BlockSpec((1, tile_b), lambda i: (0, i)),
        compiler_params=pltpu.CompilerParams(
            dimension_semantics=("parallel",)),   # shard batch tiles across TCs on v7x
    )(xT, *flat_params)

    return out[0, :batch].reshape(batch, OUTPUT_NEURONS)


def net_forward_ref(x, params):
    """Pure-JAX reference using the same bf16-operand / f32-accumulate math."""
    h = x.reshape(-1, INPUT_NEURONS).astype(jnp.float32)
    n = len(params)
    for i, (w, b) in enumerate(params):
        if i < n - 1:
            h = jnp.dot(h.astype(jnp.bfloat16), w.astype(jnp.bfloat16).T,
                        preferred_element_type=jnp.float32) + b[None, :]
            h = jnp.maximum(h, 0.0)
        else:
            h = jnp.sum(h * w.astype(jnp.float32), axis=-1, keepdims=True) + b[None, :]
    return h


if __name__ == "__main__":
    key = jax.random.PRNGKey(0)
    key, kx, kx_big = jax.random.split(key, 3)
    params = init_params(key)

    # Small deterministic input consistent with x.view(-1, 25): batch=8 rows.
    x = jax.random.normal(kx, (8, INPUT_NEURONS), dtype=jnp.float32)
    y = jax.block_until_ready(net_forward(x, params))
    y_ref = net_forward_ref(x, params)
    assert y.shape == (8, OUTPUT_NEURONS), y.shape
    assert jnp.allclose(y, y_ref, atol=1e-4, rtol=1e-4), (y, y_ref)

    # Multi-tile / padded path (batch not a multiple of the tile) exercises the grid.
    x_big = jax.random.normal(kx_big, (1000, INPUT_NEURONS), dtype=jnp.float32)
    y_big = jax.block_until_ready(net_forward(x_big, params))
    y_big_ref = net_forward_ref(x_big, params)
    assert y_big.shape == (1000, OUTPUT_NEURONS), y_big.shape
    assert jnp.allclose(y_big, y_big_ref, atol=1e-4, rtol=1e-4)

    print("KERNEL_OK")
</pallas_src>

<mosaic_0001>
module attributes {stable_mosaic.version = 11 : i64} {
  func.func @_mlp_kernel(%arg0: i32, %arg1: memref<32x128xbf16, #tpu.memory_space<vmem>>, %arg2: memref<64x32xbf16, #tpu.memory_space<vmem>>, %arg3: memref<64x1xf32, #tpu.memory_space<vmem>>, %arg4: memref<64x64xbf16, #tpu.memory_space<vmem>>, %arg5: memref<64x1xf32, #tpu.memory_space<vmem>>, %arg6: memref<64x64xbf16, #tpu.memory_space<vmem>>, %arg7: memref<64x1xf32, #tpu.memory_space<vmem>>, %arg8: memref<64x64xbf16, #tpu.memory_space<vmem>>, %arg9: memref<64x1xf32, #tpu.memory_space<vmem>>, %arg10: memref<64x64xbf16, #tpu.memory_space<vmem>>, %arg11: memref<64x1xf32, #tpu.memory_space<vmem>>, %arg12: memref<64x1xf32, #tpu.memory_space<vmem>>, %arg13: memref<1x1xf32, #tpu.memory_space<vmem>>, %arg14: memref<1x128xf32, #tpu.memory_space<vmem>>) attributes {dimension_semantics = [#tpu.dimension_semantics<parallel>], iteration_bounds = array<i64: 1>, scalar_prefetch = 0 : i64, scratch_operands = 0 : i64, tpu.core_type = #tpu.core_type<tc>, window_params = [{transform_indices = @transform_0, window_bounds = array<i64: 32, 128>}, {pipeline_mode = #tpu.pipeline_mode<synchronous>, transform_indices = @transform_1, window_bounds = array<i64: 64, 32>}, {pipeline_mode = #tpu.pipeline_mode<synchronous>, transform_indices = @transform_2, window_bounds = array<i64: 64, 1>}, {pipeline_mode = #tpu.pipeline_mode<synchronous>, transform_indices = @transform_3, window_bounds = array<i64: 64, 64>}, {pipeline_mode = #tpu.pipeline_mode<synchronous>, transform_indices = @transform_4, window_bounds = array<i64: 64, 1>}, {pipeline_mode = #tpu.pipeline_mode<synchronous>, transform_indices = @transform_5, window_bounds = array<i64: 64, 64>}, {pipeline_mode = #tpu.pipeline_mode<synchronous>, transform_indices = @transform_6, window_bounds = array<i64: 64, 1>}, {pipeline_mode = #tpu.pipeline_mode<synchronous>, transform_indices = @transform_7, window_bounds = array<i64: 64, 64>}, {pipeline_mode = #tpu.pipeline_mode<synchronous>, transform_indices = @transform_8, window_bounds = array<i64: 64, 1>}, {pipeline_mode = #tpu.pipeline_mode<synchronous>, transform_indices = @transform_9, window_bounds = array<i64: 64, 64>}, {pipeline_mode = #tpu.pipeline_mode<synchronous>, transform_indices = @transform_10, window_bounds = array<i64: 64, 1>}, {pipeline_mode = #tpu.pipeline_mode<synchronous>, transform_indices = @transform_11, window_bounds = array<i64: 64, 1>}, {pipeline_mode = #tpu.pipeline_mode<synchronous>, transform_indices = @transform_12, window_bounds = array<i64: 1, 1>}, {transform_indices = @transform_13, window_bounds = array<i64: 1, 128>}]} {
    %c0 = arith.constant 0 : index
    %c0_0 = arith.constant 0 : index
    %0 = vector.load %arg1[%c0, %c0_0] : memref<32x128xbf16, #tpu.memory_space<vmem>>, vector<32x128xbf16>
    %c0_1 = arith.constant 0 : index
    %c0_2 = arith.constant 0 : index
    %1 = vector.load %arg2[%c0_1, %c0_2] : memref<64x32xbf16, #tpu.memory_space<vmem>>, vector<64x32xbf16>
    %cst = arith.constant dense<0.000000e+00> : vector<64x128xf32>
    %2 = tpu.matmul %1, %0, %cst {dimension_numbers = #tpu.dot_dimension_numbers<[1], [0], [0], [1], [0, 0, 1, 1], [], []>} : vector<64x32xbf16>, vector<32x128xbf16>, vector<64x128xf32> -> vector<64x128xf32>
    %c0_3 = arith.constant 0 : index
    %c0_4 = arith.constant 0 : index
    %3 = vector.load %arg3[%c0_3, %c0_4] : memref<64x1xf32, #tpu.memory_space<vmem>>, vector<64x1xf32>
    %4 = vector.broadcast %3 : vector<64x1xf32> to vector<64x128xf32>
    %5 = arith.addf %2, %4 : vector<64x128xf32>
    %cst_5 = arith.constant 0.000000e+00 : f32
    %6 = vector.broadcast %cst_5 : f32 to vector<64x128xf32>
    %7 = arith.maximumf %5, %6 : vector<64x128xf32>
    %c0_6 = arith.constant 0 : index
    %c0_7 = arith.constant 0 : index
    %8 = vector.load %arg4[%c0_6, %c0_7] : memref<64x64xbf16, #tpu.memory_space<vmem>>, vector<64x64xbf16>
    %9 = arith.truncf %7 : vector<64x128xf32> to vector<64x128xbf16>
    %cst_8 = arith.constant dense<0.000000e+00> : vector<64x128xf32>
    %10 = tpu.matmul %8, %9, %cst_8 {dimension_numbers = #tpu.dot_dimension_numbers<[1], [0], [0], [1], [0, 0, 1, 1], [], []>} : vector<64x64xbf16>, vector<64x128xbf16>, vector<64x128xf32> -> vector<64x128xf32>
    %c0_9 = arith.constant 0 : index
    %c0_10 = arith.constant 0 : index
    %11 = vector.load %arg5[%c0_9, %c0_10] : memref<64x1xf32, #tpu.memory_space<vmem>>, vector<64x1xf32>
    %12 = vector.broadcast %11 : vector<64x1xf32> to vector<64x128xf32>
    %13 = arith.addf %10, %12 : vector<64x128xf32>
    %cst_11 = arith.constant 0.000000e+00 : f32
    %14 = vector.broadcast %cst_11 : f32 to vector<64x128xf32>
    %15 = arith.maximumf %13, %14 : vector<64x128xf32>
    %c0_12 = arith.constant 0 : index
    %c0_13 = arith.constant 0 : index
    %16 = vector.load %arg6[%c0_12, %c0_13] : memref<64x64xbf16, #tpu.memory_space<vmem>>, vector<64x64xbf16>
    %17 = arith.truncf %15 : vector<64x128xf32> to vector<64x128xbf16>
    %cst_14 = arith.constant dense<0.000000e+00> : vector<64x128xf32>
    %18 = tpu.matmul %16, %17, %cst_14 {dimension_numbers = #tpu.dot_dimension_numbers<[1], [0], [0], [1], [0, 0, 1, 1], [], []>} : vector<64x64xbf16>, vector<64x128xbf16>, vector<64x128xf32> -> vector<64x128xf32>
    %c0_15 = arith.constant 0 : index
    %c0_16 = arith.constant 0 : index
    %19 = vector.load %arg7[%c0_15, %c0_16] : memref<64x1xf32, #tpu.memory_space<vmem>>, vector<64x1xf32>
    %20 = vector.broadcast %19 : vector<64x1xf32> to vector<64x128xf32>
    %21 = arith.addf %18, %20 : vector<64x128xf32>
    %cst_17 = arith.constant 0.000000e+00 : f32
    %22 = vector.broadcast %cst_17 : f32 to vector<64x128xf32>
    %23 = arith.maximumf %21, %22 : vector<64x128xf32>
    %c0_18 = arith.constant 0 : index
    %c0_19 = arith.constant 0 : index
    %24 = vector.load %arg8[%c0_18, %c0_19] : memref<64x64xbf16, #tpu.memory_space<vmem>>, vector<64x64xbf16>
    %25 = arith.truncf %23 : vector<64x128xf32> to vector<64x128xbf16>
    %cst_20 = arith.constant dense<0.000000e+00> : vector<64x128xf32>
    %26 = tpu.matmul %24, %25, %cst_20 {dimension_numbers = #tpu.dot_dimension_numbers<[1], [0], [0], [1], [0, 0, 1, 1], [], []>} : vector<64x64xbf16>, vector<64x128xbf16>, vector<64x128xf32> -> vector<64x128xf32>
    %c0_21 = arith.constant 0 : index
    %c0_22 = arith.constant 0 : index
    %27 = vector.load %arg9[%c0_21, %c0_22] : memref<64x1xf32, #tpu.memory_space<vmem>>, vector<64x1xf32>
    %28 = vector.broadcast %27 : vector<64x1xf32> to vector<64x128xf32>
    %29 = arith.addf %26, %28 : vector<64x128xf32>
    %cst_23 = arith.constant 0.000000e+00 : f32
    %30 = vector.broadcast %cst_23 : f32 to vector<64x128xf32>
    %31 = arith.maximumf %29, %30 : vector<64x128xf32>
    %c0_24 = arith.constant 0 : index
    %c0_25 = arith.constant 0 : index
    %32 = vector.load %arg10[%c0_24, %c0_25] : memref<64x64xbf16, #tpu.memory_space<vmem>>, vector<64x64xbf16>
    %33 = arith.truncf %31 : vector<64x128xf32> to vector<64x128xbf16>
    %cst_26 = arith.constant dense<0.000000e+00> : vector<64x128xf32>
    %34 = tpu.matmul %32, %33, %cst_26 {dimension_numbers = #tpu.dot_dimension_numbers<[1], [0], [0], [1], [0, 0, 1, 1], [], []>} : vector<64x64xbf16>, vector<64x128xbf16>, vector<64x128xf32> -> vector<64x128xf32>
    %c0_27 = arith.constant 0 : index
    %c0_28 = arith.constant 0 : index
    %35 = vector.load %arg11[%c0_27, %c0_28] : memref<64x1xf32, #tpu.memory_space<vmem>>, vector<64x1xf32>
    %36 = vector.broadcast %35 : vector<64x1xf32> to vector<64x128xf32>
    %37 = arith.addf %34, %36 : vector<64x128xf32>
    %cst_29 = arith.constant 0.000000e+00 : f32
    %38 = vector.broadcast %cst_29 : f32 to vector<64x128xf32>
    %39 = arith.maximumf %37, %38 : vector<64x128xf32>
    %c0_30 = arith.constant 0 : index
    %c0_31 = arith.constant 0 : index
    %40 = vector.load %arg12[%c0_30, %c0_31] : memref<64x1xf32, #tpu.memory_space<vmem>>, vector<64x1xf32>
    %41 = vector.broadcast %40 : vector<64x1xf32> to vector<64x128xf32>
    %42 = arith.mulf %39, %41 : vector<64x128xf32>
    %cst_32 = arith.constant dense<0.000000e+00> : vector<128xf32>
    %43 = vector.multi_reduction <add>, %42, %cst_32 [0] : vector<64x128xf32> to vector<128xf32>
    %44 = vector.shape_cast %43 : vector<128xf32> to vector<1x128xf32>
    %c0_33 = arith.constant 0 : index
    %c0_34 = arith.constant 0 : index
    %45 = vector.load %arg13[%c0_33, %c0_34] : memref<1x1xf32, #tpu.memory_space<vmem>>, vector<1x1xf32>
    %46 = vector.broadcast %45 : vector<1x1xf32> to vector<1x128xf32>
    %47 = arith.addf %44, %46 : vector<1x128xf32>
    %c0_35 = arith.constant 0 : index
    %c0_36 = arith.constant 0 : index
    %48 = vector.load %arg14[%c0_35, %c0_36] : memref<1x128xf32, #tpu.memory_space<vmem>>, vector<1x128xf32>
    tpu.vector_store %arg14[%c0_35, %c0_36], %47 {strides = array<i32>} : memref<1x128xf32, #tpu.memory_space<vmem>>, vector<1x128xf32>,
    return
  }
  func.func @transform_0(%arg0: i32) -> (i32, i32) {
    %c0_i32 = arith.constant 0 : i32
    %c0_i32_0 = arith.constant 0 : i32
    return %c0_i32, %arg0 : i32, i32
  }
  func.func @transform_1(%arg0: i32) -> (i32, i32) {
    %c0_i32 = arith.constant 0 : i32
    %c0_i32_0 = arith.constant 0 : i32
    %c0_i32_1 = arith.constant 0 : i32
    return %c0_i32, %c0_i32_0 : i32, i32
  }
  func.func @transform_2(%arg0: i32) -> (i32, i32) {
    %c0_i32 = arith.constant 0 : i32
    %c0_i32_0 = arith.constant 0 : i32
    %c0_i32_1 = arith.constant 0 : i32
    return %c0_i32, %c0_i32_0 : i32, i32
  }
  func.func @transform_3(%arg0: i32) -> (i32, i32) {
    %c0_i32 = arith.constant 0 : i32
    %c0_i32_0 = arith.constant 0 : i32
    %c0_i32_1 = arith.constant 0 : i32
    return %c0_i32, %c0_i32_0 : i32, i32
  }
  func.func @transform_4(%arg0: i32) -> (i32, i32) {
    %c0_i32 = arith.constant 0 : i32
    %c0_i32_0 = arith.constant 0 : i32
    %c0_i32_1 = arith.constant 0 : i32
    return %c0_i32, %c0_i32_0 : i32, i32
  }
  func.func @transform_5(%arg0: i32) -> (i32, i32) {
    %c0_i32 = arith.constant 0 : i32
    %c0_i32_0 = arith.constant 0 : i32
    %c0_i32_1 = arith.constant 0 : i32
    return %c0_i32, %c0_i32_0 : i32, i32
  }
  func.func @transform_6(%arg0: i32) -> (i32, i32) {
    %c0_i32 = arith.constant 0 : i32
    %c0_i32_0 = arith.constant 0 : i32
    %c0_i32_1 = arith.constant 0 : i32
    return %c0_i32, %c0_i32_0 : i32, i32
  }
  func.func @transform_7(%arg0: i32) -> (i32, i32) {
    %c0_i32 = arith.constant 0 : i32
    %c0_i32_0 = arith.constant 0 : i32
    %c0_i32_1 = arith.constant 0 : i32
    return %c0_i32, %c0_i32_0 : i32, i32
  }
  func.func @transform_8(%arg0: i32) -> (i32, i32) {
    %c0_i32 = arith.constant 0 : i32
    %c0_i32_0 = arith.constant 0 : i32
    %c0_i32_1 = arith.constant 0 : i32
    return %c0_i32, %c0_i32_0 : i32, i32
  }
  func.func @transform_9(%arg0: i32) -> (i32, i32) {
    %c0_i32 = arith.constant 0 : i32
    %c0_i32_0 = arith.constant 0 : i32
    %c0_i32_1 = arith.constant 0 : i32
    return %c0_i32, %c0_i32_0 : i32, i32
  }
  func.func @transform_10(%arg0: i32) -> (i32, i32) {
    %c0_i32 = arith.constant 0 : i32
    %c0_i32_0 = arith.constant 0 : i32
    %c0_i32_1 = arith.constant 0 : i32
    return %c0_i32, %c0_i32_0 : i32, i32
  }
  func.func @transform_11(%arg0: i32) -> (i32, i32) {
    %c0_i32 = arith.constant 0 : i32
    %c0_i32_0 = arith.constant 0 : i32
    %c0_i32_1 = arith.constant 0 : i32
    return %c0_i32, %c0_i32_0 : i32, i32
  }
  func.func @transform_12(%arg0: i32) -> (i32, i32) {
    %c0_i32 = arith.constant 0 : i32
    %c0_i32_0 = arith.constant 0 : i32
    %c0_i32_1 = arith.constant 0 : i32
    return %c0_i32, %c0_i32_0 : i32, i32
  }
  func.func @transform_13(%arg0: i32) -> (i32, i32) {
    %c0_i32 = arith.constant 0 : i32
    %c0_i32_0 = arith.constant 0 : i32
    return %c0_i32, %arg0 : i32, i32
  }
}

</mosaic_0001>

<bundles_post_ra>
// kernel: net_forward.1
= control target key start
LH: loop header
LB: loop body
LE: loop exit
PB: predicated region body
PF: predicated region fallthrough
CT: control target
= control target key end

     0   :  { %v1152_v0 = vmov 0   ;;  %vm139_vm0 = vcmask 261120   ;;  %vm305_vm1 = vcmask 523264   ;;  %s1459_s2 = inlined_call_operand.vmem [shape: f32[64,1], index: 2, kind: input, shape index: {}]   ;;  %s1460_s0 = inlined_call_operand.vmem [shape: bf16[32,128], index: 0, kind: input, shape index: {}]   ;;  %s1461_s12 = inlined_call_operand.<no memory space> [shape: f32[1,1], index: 12, kind: input, shape index: {}]   ;;  %s1462_s1 = inlined_call_operand.vmem [shape: bf16[64,32], index: 1, kind: input, shape index: {}]   ;;  %s1463_s4 = inlined_call_operand.vmem [shape: f32[64,1], index: 4, kind: input, shape index: {}]   ;;  %s1464_s6 = inlined_call_operand.vmem [shape: f32[64,1], index: 6, kind: input, shape index: {}]   ;;  %s1465_s8 = inlined_call_operand.vmem [shape: f32[64,1], index: 8, kind: input, shape index: {}]   ;;  %s1466_s10 = inlined_call_operand.vmem [shape: f32[64,1], index: 10, kind: input, shape index: {}]   ;;  %s1467_s11 = inlined_call_operand.vmem [shape: f32[64,1], index: 11, kind: input, shape index: {}]   ;;  %s1468_s3 = inlined_call_operand.vmem [shape: bf16[64,64], index: 3, kind: input, shape index: {}]   ;;  %s1469_s5 = inlined_call_operand.vmem [shape: bf16[64,64], index: 5, kind: input, shape index: {}]   ;;  %s1470_s7 = inlined_call_operand.vmem [shape: bf16[64,64], index: 7, kind: input, shape index: {}]   ;;  %s1471_s9 = inlined_call_operand.vmem [shape: bf16[64,64], index: 9, kind: input, shape index: {}]   ;;  %s1472_s13 = inlined_call_operand.vmem [shape: f32[1,128], index: 13, kind: output, shape index: {}]  }
   0x1   :  { %1128 = vset.pattern.permute.xlu0 %v1152_v0  ;;  %v59_v1 = vld [vmem:[%s1459_s2] sm:$0xff]  ;;  %1129 = vset.pattern.permute.xlu1 %v1152_v0  ;;  %v18_v2 = vstv %s1461_s12  ;;  %v60_v4 = vld [vmem:[%s1459_s2 + $0x8] sm:$0xff]  ;;  %v61_v5 = vld [vmem:[%s1459_s2 + $0x10] sm:$0xff] }
   0x2   :  { %69 = vperm.xlu0 %1128, %v59_v1   ;;  %v1130_v3 = vld [vmem:[%s1460_s0] sm:$0xff]   ;;  %19 = vst [vmem:[#allocation2] sm:$0x1] %v18_v2  ;;  %79 = vperm.xlu1 %1129, %v61_v5   ;;  %v1131_v6 = vld [vmem:[%s1460_s0 + $0x8] sm:$0xff]   ;;  %v62_v7 = vld [vmem:[%s1459_s2 + $0x18] sm:$0xff] }
   0x3   :  { %1051 = vmatprep.subr.bf16.mxu0 %v1130_v3  ;;  %v1132_v8 = vld [vmem:[%s1462_s1] sm:$0xff]   ;;  %v1133_v10 = vld [vmem:[%s1462_s1 + $0x8] sm:$0xff]   ;;  %v1134_v12 = vld [vmem:[%s1462_s1 + $0x10] sm:$0xff]  }
   0x4   :  { %1052 = vmatpush3.bf16.msra.mxu0 %v1130_v3  ;;  %v63_v9 = vld [vmem:[%s1459_s2 + $0x20] sm:$0xff]  ;;  %1055 = vmatprep.mubr.msk.bf16.mxu0 %vm139_vm0, %v1132_v8  ;;  %v64_v11 = vld [vmem:[%s1459_s2 + $0x28] sm:$0xff]  ;;  %v65_v13 = vld [vmem:[%s1459_s2 + $0x30] sm:$0xff] }
   0x5   :  { %1053 = vmatprep.subr.bf16.mxu0 %v1131_v6  ;;  %v66_v14 = vld [vmem:[%s1459_s2 + $0x38] sm:$0xff]  ;;  %v237_v15 = vld [vmem:[%s1463_s4] sm:$0xff]  ;;  %v238_v17 = vld [vmem:[%s1463_s4 + $0x8] sm:$0xff] }
   0x6   :  { %74 = vperm.xlu0 %1128, %v60_v4   ;;  %84 = vperm.xlu1 %1129, %v62_v7   ;;  %v1135_v16 = vld [vmem:[%s1462_s1 + $0x18] sm:$0xff]   ;;  %v239_v18 = vld [vmem:[%s1463_s4 + $0x10] sm:$0xff]  ;;  %v241_v20 = vld [vmem:[%s1463_s4 + $0x20] sm:$0xff] }
   0x7   :  { %v240_v19 = vld [vmem:[%s1463_s4 + $0x18] sm:$0xff]  ;;  %v242_v21 = vld [vmem:[%s1463_s4 + $0x28] sm:$0xff]  ;;  %v243_v22 = vld [vmem:[%s1463_s4 + $0x30] sm:$0xff] }
   0x8   :  { %1054 = vmatpush3.bf16.msra.mxu0 %v1131_v6  ;;  %v244_v23 = vld [vmem:[%s1463_s4 + $0x38] sm:$0xff]  ;;  %v403_v24 = vld [vmem:[%s1464_s6] sm:$0xff]  ;;  %v404_v25 = vld [vmem:[%s1464_s6 + $0x8] sm:$0xff] }
   0x9   :  { %v405_v26 = vld [vmem:[%s1464_s6 + $0x10] sm:$0xff]  ;;  %v406_v27 = vld [vmem:[%s1464_s6 + $0x18] sm:$0xff]  ;;  %v407_v28 = vld [vmem:[%s1464_s6 + $0x20] sm:$0xff] }
   0xa   :  { %89 = vperm.xlu0 %1128, %v63_v9   ;;  %94 = vperm.xlu1 %1129, %v64_v11   ;;  %v408_v29 = vld [vmem:[%s1464_s6 + $0x28] sm:$0xff]  ;;  %v409_v30 = vld [vmem:[%s1464_s6 + $0x30] sm:$0xff]  ;;  %v410_v31 = vld [vmem:[%s1464_s6 + $0x38] sm:$0xff] }
   0xb   :  { %1056 = vmatmul.mubr.msk.bf16.vlgmr.msra.gmra.mrb[0].mxu0 %vm139_vm0, %v1133_v10  ;;  %v568_v32 = vld [vmem:[%s1465_s8] sm:$0xff]  ;;  %v569_v33 = vld [vmem:[%s1465_s8 + $0x8] sm:$0xff]  ;;  %v570_v34 = vld [vmem:[%s1465_s8 + $0x10] sm:$0xff] }
   0xc   :  { %1059 = vmatprep.mubr.msk.bf16.mxu0 %vm139_vm0, %v1134_v12  ;;  %v571_v35 = vld [vmem:[%s1465_s8 + $0x18] sm:$0xff]  ;;  %v572_v36 = vld [vmem:[%s1465_s8 + $0x20] sm:$0xff]  ;;  %v573_v37 = vld [vmem:[%s1465_s8 + $0x28] sm:$0xff] }
   0xd   :  { %v574_v38 = vld [vmem:[%s1465_s8 + $0x30] sm:$0xff]  ;;  %v575_v39 = vld [vmem:[%s1465_s8 + $0x38] sm:$0xff]  ;;  %v733_v40 = vld [vmem:[%s1466_s10] sm:$0xff] }
   0xe   :  { %99 = vperm.xlu0 %1128, %v65_v13   ;;  %104 = vperm.xlu1 %1129, %v66_v14   ;;  %v734_v41 = vld [vmem:[%s1466_s10 + $0x8] sm:$0xff]  ;;  %v735_v42 = vld [vmem:[%s1466_s10 + $0x10] sm:$0xff]  ;;  %v736_v43 = vld [vmem:[%s1466_s10 + $0x18] sm:$0xff] }
   0xf   :  { %v886_v44 = vld [vmem:[%s1467_s11] sm:$0xff]  ;;  %v887_v45 = vld [vmem:[%s1467_s11 + $0x8] sm:$0xff]  ;;  %v888_v47 = vld [vmem:[%s1467_s11 + $0x10] sm:$0xff] }
  0x10   :  { %v737_v46 = vld [vmem:[%s1466_s10 + $0x20] sm:$0xff]  ;;  %v738_v48 = vld [vmem:[%s1466_s10 + $0x28] sm:$0xff]  ;;  %v889_v49 = vld [vmem:[%s1467_s11 + $0x18] sm:$0xff] }
  0x11   :  { %v739_v50 = vld [vmem:[%s1466_s10 + $0x30] sm:$0xff]  ;;  %v890_v51 = vld [vmem:[%s1467_s11 + $0x20] sm:$0xff]  ;;  %v740_v52 = vld [vmem:[%s1466_s10 + $0x38] sm:$0xff] }
  0x12   :  { %247 = vperm.xlu0 %1128, %v237_v15   ;;  %252 = vperm.xlu1 %1129, %v238_v17   ;;  %v891_v53 = vld [vmem:[%s1467_s11 + $0x28] sm:$0xff]  ;;  %v892_v54 = vld [vmem:[%s1467_s11 + $0x30] sm:$0xff]  ;;  %v893_v55 = vld [vmem:[%s1467_s11 + $0x38] sm:$0xff] }
  0x13   :  { %1060 = vmatmul.mubr.msk.bf16.gmra.mrb[4].mxu0 %vm139_vm0, %v1135_v16  ;;  %v955_v56 = vld [vmem:[#allocation2] sm:$0x1] }
  0x14   :  { %v1136_v57 = vld [vmem:[%s1468_s3] sm:$0xff]  }
  0x15   :  { %1071 = vmatprep.mubr.msk.bf16.mxu1 %vm305_vm1, %v1136_v57 }
  0x16   :  { %257 = vperm.xlu0 %1128, %v239_v18   ;;  %262 = vperm.xlu1 %1129, %v240_v19  }
  0x1a   :  { %267 = vperm.xlu0 %1128, %v241_v20   ;;  %272 = vperm.xlu1 %1129, %v242_v21  }
  0x1e   :  { %277 = vperm.xlu0 %1128, %v243_v22   ;;  %282 = vperm.xlu1 %1129, %v244_v23  }
  0x22   :  { %413 = vperm.xlu0 %1128, %v403_v24   ;;  %418 = vperm.xlu1 %1129, %v404_v25  }
  0x26   :  { %423 = vperm.xlu0 %1128, %v405_v26   ;;  %428 = vperm.xlu1 %1129, %v406_v27  }
  0x2a   :  { %433 = vperm.xlu0 %1128, %v407_v28   ;;  %438 = vperm.xlu1 %1129, %v408_v29  }
  0x2e   :  { %443 = vperm.xlu0 %1128, %v409_v30   ;;  %448 = vperm.xlu1 %1129, %v410_v31   ;;  %v1137_v30 = vld [vmem:[%s1468_s3 + $0x8] sm:$0xff]   ;;  %v1138_v31 = vld [vmem:[%s1468_s3 + $0x10] sm:$0xff]  }
  0x32   :  { %578 = vperm.xlu0 %1128, %v568_v32   ;;  %583 = vperm.xlu1 %1129, %v569_v33   ;;  %v1139_v32 = vld [vmem:[%s1468_s3 + $0x18] sm:$0xff]   ;;  %v1140_v33 = vld [vmem:[%s1469_s5] sm:$0xff]  }
  0x33   :  { %1087 = vmatprep.mubr.msk.bf16.mxu0 %vm305_vm1, %v1140_v33 }
  0x36   :  { %588 = vperm.xlu0 %1128, %v570_v34   ;;  %593 = vperm.xlu1 %1129, %v571_v35  }
  0x3a   :  { %598 = vperm.xlu0 %1128, %v572_v36   ;;  %603 = vperm.xlu1 %1129, %v573_v37  }
  0x3e   :  { %608 = vperm.xlu0 %1128, %v574_v38   ;;  %613 = vperm.xlu1 %1129, %v575_v39  }
  0x42   :  { %743 = vperm.xlu0 %1128, %v733_v40   ;;  %748 = vperm.xlu1 %1129, %v734_v41  }
  0x46   :  { %753 = vperm.xlu0 %1128, %v735_v42   ;;  %758 = vperm.xlu1 %1129, %v736_v43  }
  0x4a   :  { %896 = vperm.xlu0 %1128, %v886_v44   ;;  %901 = vperm.xlu1 %1129, %v887_v45  }
  0x4e   :  { %763 = vperm.xlu0 %1128, %v737_v46   ;;  %906 = vperm.xlu1 %1129, %v888_v47  }
  0x52   :  { %768 = vperm.xlu0 %1128, %v738_v48   ;;  %911 = vperm.xlu1 %1129, %v889_v49  }
  0x56   :  { %773 = vperm.xlu0 %1128, %v739_v50   ;;  %916 = vperm.xlu1 %1129, %v890_v51  }
  0x5a   :  { %778 = vperm.xlu0 %1128, %v740_v52   ;;  %921 = vperm.xlu1 %1129, %v891_v53  }
  0x5e   :  { %926 = vperm.xlu0 %1128, %v892_v54   ;;  %931 = vperm.xlu1 %1129, %v893_v55  }
  0x62   :  { %958 = vperm.xlu0 %1128, %v955_v56  }
  0x81   :  { %v70_v58 = vpop.permute.xlu0 %69  ;;  %v80_v59 = vpop.permute.xlu1 %79 }
  0x85   :  { %v75_v60 = vpop.permute.xlu0 %74  ;;  %v85_v61 = vpop.permute.xlu1 %84 }
  0x89   :  { %v90_v1 = vpop.permute.xlu0 %89  ;;  %v95_v6 = vpop.permute.xlu1 %94 }
  0x8d   :  { %v100_v13 = vpop.permute.xlu0 %99  ;;  %v105_v18 = vpop.permute.xlu1 %104 }
  0x91   :  { %v248_v34 = vpop.permute.xlu0 %247  ;;  %v253_v35 = vpop.permute.xlu1 %252 }
  0x95   :  { %v258_v36 = vpop.permute.xlu0 %257  ;;  %v263_v37 = vpop.permute.xlu1 %262 }
  0x99   :  { %v268_v41 = vpop.permute.xlu0 %267  ;;  %v273_v46 = vpop.permute.xlu1 %272 }
  0x9d   :  { %v278_v53 = vpop.permute.xlu0 %277 }
  0xde   :  { %v1057_v62 = vpop.f32.mrb[0].mxu0 }
  0xdf   :  { %v195_v63 = vadd.f32 %v1057_v62, %v80_v59  ;;  %v186_v0 = vpop.f32.mrb[1].mxu0 }
  0xe0   :  { %v187_v2 = vadd.f32 %v186_v0, %v70_v58  ;;  %v1058_v3 = vpop.f32.mrb[2].mxu0  ;;  %v283_v58 = vpop.permute.xlu1 %282 }
  0xe1   :  { %v198_v4 = vadd.f32 %v1058_v3, %v85_v61  ;;  %v189_v5 = vpop.f32.mrb[3].mxu0  ;;  %v219_v8 = vmax.f32 %v195_v63, 0.0 }
  0xe2   :  { %v190_v7 = vadd.f32 %v189_v5, %v75_v60  ;;  %v217_v10 = vmax.f32 %v187_v2, 0.0 }
  0xe3   :  { %v220_v9 = vmax.f32 %v198_v4, 0.0 }
  0xe4   :  { %v218_v11 = vmax.f32 %v190_v7, 0.0  ;;  %v1142_v7 = vld [vmem:[%s1469_s5 + $0x10] sm:$0xff]  }
  0xe5   :  { %v234_v12 = vpack.c.bf16 %v220_v9, %v219_v8  ;;  %v1143_v8 = vld [vmem:[%s1469_s5 + $0x18] sm:$0xff]   ;;  %v1144_v9 = vld [vmem:[%s1470_s7] sm:$0xff]  }
  0xe6   :  { %v1061_v14 = vpop.f32.mrb[4].mxu0  ;;  %v233_v15 = vpack.c.bf16 %v218_v11, %v217_v10  ;;  %v414_v10 = vpop.permute.xlu0 %413 }
  0xe7   :  { %v211_v16 = vadd.f32 %v1061_v14, %v100_v13  ;;  %v202_v17 = vpop.f32.mrb[5].mxu0  ;;  %v419_v11 = vpop.permute.xlu1 %418 }
  0xe8   :  { %v203_v19 = vadd.f32 %v202_v17, %v90_v1  ;;  %v1062_v20 = vpop.f32.mrb[6].mxu0  ;;  %1063 = vmatprep.subr.bf16.mxu1 %v233_v15 }
  0xe9   :  { %v214_v21 = vadd.f32 %v1062_v20, %v105_v18  ;;  %v205_v22 = vpop.f32.mrb[7].mxu0  ;;  %1064 = vmatpush3.bf16.msra.mxu1 %v233_v15  ;;  %v223_v24 = vmax.f32 %v211_v16, 0.0 }
  0xea   :  { %v206_v23 = vadd.f32 %v205_v22, %v95_v6  ;;  %1065 = vmatprep.subr.bf16.mxu1 %v234_v12  ;;  %v221_v26 = vmax.f32 %v203_v19, 0.0  ;;  %v1141_v6 = vld [vmem:[%s1469_s5 + $0x8] sm:$0xff]  }
  0xeb   :  { %v224_v25 = vmax.f32 %v214_v21, 0.0  ;;  %v429_v13 = vpop.permute.xlu1 %428 }
  0xec   :  { %v222_v27 = vmax.f32 %v206_v23, 0.0 }
  0xed   :  { %v236_v28 = vpack.c.bf16 %v224_v25, %v223_v24  ;;  %1066 = vmatpush3.bf16.msra.mxu1 %v234_v12  ;;  %v424_v12 = vpop.permute.xlu0 %423 }
  0xee   :  { %v235_v29 = vpack.c.bf16 %v222_v27, %v221_v26 }
  0xef   :  { %v439_v22 = vpop.permute.xlu1 %438 }
  0xf0   :  { %1067 = vmatprep.subr.bf16.mxu1 %v235_v29 }
  0xf1   :  { %1068 = vmatpush3.bf16.msra.mxu1 %v235_v29  ;;  %v434_v17 = vpop.permute.xlu0 %433 }
  0xf2   :  { %1069 = vmatprep.subr.bf16.mxu1 %v236_v28 }
  0xf5   :  { %1070 = vmatpush3.bf16.msra.mxu1 %v236_v28  ;;  %v444_v29 = vpop.permute.xlu0 %443 }
  0xf8   :  { %1072 = vmatmul.mubr.msk.bf16.vlgmr.msra.gmra.mrb[0].mxu1 %vm305_vm1, %v1137_v30 }
  0xf9   :  { %1075 = vmatprep.mubr.msk.bf16.mxu1 %vm305_vm1, %v1138_v31 }
 0x100   :  { %1076 = vmatmul.mubr.msk.bf16.gmra.mrb[4].mxu1 %vm305_vm1, %v1139_v32 }
 0x101   :  { %1103 = vmatprep.mubr.msk.bf16.mxu1 %vm305_vm1, %v1144_v9 }
 0x1cb   :  { %v1073_v38 = vpop.f32.mrb[0].mxu1 }
 0x1cc   :  { %v361_v39 = vadd.f32 %v1073_v38, %v258_v36  ;;  %v352_v40 = vpop.f32.mrb[1].mxu1 }
 0x1cd   :  { %v353_v42 = vadd.f32 %v352_v40, %v248_v34  ;;  %v1074_v43 = vpop.f32.mrb[2].mxu1  ;;  %v449_v34 = vpop.permute.xlu1 %448 }
 0x1ce   :  { %v364_v44 = vadd.f32 %v1074_v43, %v263_v37  ;;  %v355_v45 = vpop.f32.mrb[3].mxu1  ;;  %v385_v48 = vmax.f32 %v361_v39, 0.0 }
 0x1cf   :  { %v356_v47 = vadd.f32 %v355_v45, %v253_v35  ;;  %v383_v50 = vmax.f32 %v353_v42, 0.0 }
 0x1d0   :  { %v386_v49 = vmax.f32 %v364_v44, 0.0 }
 0x1d1   :  { %v384_v51 = vmax.f32 %v356_v47, 0.0  ;;  %v1146_v47 = vld [vmem:[%s1470_s7 + $0x10] sm:$0xff]  }
 0x1d2   :  { %v400_v52 = vpack.c.bf16 %v386_v49, %v385_v48  ;;  %v1147_v48 = vld [vmem:[%s1470_s7 + $0x18] sm:$0xff]   ;;  %v1148_v49 = vld [vmem:[%s1471_s9] sm:$0xff]  }
 0x1d3   :  { %v399_v54 = vpack.c.bf16 %v384_v51, %v383_v50  ;;  %v1077_v55 = vpop.f32.mrb[4].mxu1  ;;  %v579_v50 = vpop.permute.xlu0 %578 }
 0x1d4   :  { %v377_v56 = vadd.f32 %v1077_v55, %v278_v53  ;;  %v368_v57 = vpop.f32.mrb[5].mxu1  ;;  %v584_v51 = vpop.permute.xlu1 %583 }
 0x1d5   :  { %v369_v59 = vadd.f32 %v368_v57, %v268_v41  ;;  %v1078_v60 = vpop.f32.mrb[6].mxu1  ;;  %1079 = vmatprep.subr.bf16.mxu0 %v399_v54 }
 0x1d6   :  { %v380_v61 = vadd.f32 %v1078_v60, %v283_v58  ;;  %v371_v62 = vpop.f32.mrb[7].mxu1  ;;  %1080 = vmatpush3.bf16.msra.mxu0 %v399_v54  ;;  %v389_v0 = vmax.f32 %v377_v56, 0.0 }
 0x1d7   :  { %v372_v63 = vadd.f32 %v371_v62, %v273_v46  ;;  %1081 = vmatprep.subr.bf16.mxu0 %v400_v52  ;;  %v387_v2 = vmax.f32 %v369_v59, 0.0  ;;  %v1145_v46 = vld [vmem:[%s1470_s7 + $0x8] sm:$0xff]  }
 0x1d8   :  { %v390_v1 = vmax.f32 %v380_v61, 0.0  ;;  %v594_v53 = vpop.permute.xlu1 %593 }
 0x1d9   :  { %v388_v3 = vmax.f32 %v372_v63, 0.0 }
 0x1da   :  { %v402_v4 = vpack.c.bf16 %v390_v1, %v389_v0  ;;  %1082 = vmatpush3.bf16.msra.mxu0 %v400_v52  ;;  %v589_v52 = vpop.permute.xlu0 %588 }
 0x1db   :  { %v401_v5 = vpack.c.bf16 %v388_v3, %v387_v2 }
 0x1dc   :  { %v604_v62 = vpop.permute.xlu1 %603 }
 0x1dd   :  { %1083 = vmatprep.subr.bf16.mxu0 %v401_v5 }
 0x1de   :  { %1084 = vmatpush3.bf16.msra.mxu0 %v401_v5  ;;  %v599_v57 = vpop.permute.xlu0 %598 }
 0x1df   :  { %1085 = vmatprep.subr.bf16.mxu0 %v402_v4 }
 0x1e2   :  { %1086 = vmatpush3.bf16.msra.mxu0 %v402_v4  ;;  %v609_v5 = vpop.permute.xlu0 %608 }
 0x1e5   :  { %1088 = vmatmul.mubr.msk.bf16.vlgmr.msra.gmra.mrb[8].mxu0 %vm305_vm1, %v1141_v6 }
 0x1e6   :  { %1091 = vmatprep.mubr.msk.bf16.mxu0 %vm305_vm1, %v1142_v7 }
 0x1ed   :  { %1092 = vmatmul.mubr.msk.bf16.gmra.mrb[12].mxu0 %vm305_vm1, %v1143_v8 }
 0x1ee   :  { %1119 = vmatprep.mubr.msk.bf16.mxu0 %vm305_vm1, %v1148_v49 }
 0x2b8   :  { %v1089_v14 = vpop.f32.mrb[8].mxu0 }
 0x2b9   :  { %v526_v15 = vadd.f32 %v1089_v14, %v424_v12  ;;  %v517_v16 = vpop.f32.mrb[9].mxu0 }
 0x2ba   :  { %v518_v18 = vadd.f32 %v517_v16, %v414_v10  ;;  %v1090_v19 = vpop.f32.mrb[10].mxu0  ;;  %v614_v10 = vpop.permute.xlu1 %613 }
 0x2bb   :  { %v529_v20 = vadd.f32 %v1090_v19, %v429_v13  ;;  %v520_v21 = vpop.f32.mrb[11].mxu0  ;;  %v550_v24 = vmax.f32 %v526_v15, 0.0 }
 0x2bc   :  { %v521_v23 = vadd.f32 %v520_v21, %v419_v11  ;;  %v548_v26 = vmax.f32 %v518_v18, 0.0 }
 0x2bd   :  { %v551_v25 = vmax.f32 %v529_v20, 0.0 }
 0x2be   :  { %v549_v27 = vmax.f32 %v521_v23, 0.0  ;;  %v1150_v23 = vld [vmem:[%s1471_s9 + $0x10] sm:$0xff]  }
 0x2bf   :  { %v565_v28 = vpack.c.bf16 %v551_v25, %v550_v24  ;;  %v1151_v24 = vld [vmem:[%s1471_s9 + $0x18] sm:$0xff]   ;;  %v744_v25 = vpop.permute.xlu0 %743 }
 0x2c0   :  { %v564_v30 = vpack.c.bf16 %v549_v27, %v548_v26  ;;  %v1093_v31 = vpop.f32.mrb[12].mxu0  ;;  %v749_v26 = vpop.permute.xlu1 %748 }
 0x2c1   :  { %v542_v32 = vadd.f32 %v1093_v31, %v444_v29  ;;  %v533_v33 = vpop.f32.mrb[13].mxu0 }
 0x2c2   :  { %v534_v35 = vadd.f32 %v533_v33, %v434_v17  ;;  %v1094_v36 = vpop.f32.mrb[14].mxu0  ;;  %1095 = vmatprep.subr.bf16.mxu1 %v564_v30 }
 0x2c3   :  { %v545_v37 = vadd.f32 %v1094_v36, %v449_v34  ;;  %v536_v38 = vpop.f32.mrb[15].mxu0  ;;  %1096 = vmatpush3.bf16.msra.mxu1 %v564_v30  ;;  %v554_v40 = vmax.f32 %v542_v32, 0.0  ;;  %v754_v27 = vpop.permute.xlu0 %753 }
 0x2c4   :  { %v537_v39 = vadd.f32 %v536_v38, %v439_v22  ;;  %1097 = vmatprep.subr.bf16.mxu1 %v565_v28  ;;  %v552_v42 = vmax.f32 %v534_v35, 0.0  ;;  %v1149_v22 = vld [vmem:[%s1471_s9 + $0x8] sm:$0xff]  }
 0x2c5   :  { %v555_v41 = vmax.f32 %v545_v37, 0.0 }
 0x2c6   :  { %v553_v43 = vmax.f32 %v537_v39, 0.0 }
 0x2c7   :  { %v567_v44 = vpack.c.bf16 %v555_v41, %v554_v40  ;;  %1098 = vmatpush3.bf16.msra.mxu1 %v565_v28  ;;  %v759_v28 = vpop.permute.xlu1 %758  ;;  %v897_v29 = vpop.permute.xlu0 %896 }
 0x2c8   :  { %v566_v45 = vpack.c.bf16 %v553_v43, %v552_v42 }
 0x2ca   :  { %1099 = vmatprep.subr.bf16.mxu1 %v566_v45 }
 0x2cb   :  { %1100 = vmatpush3.bf16.msra.mxu1 %v566_v45  ;;  %v902_v30 = vpop.permute.xlu1 %901  ;;  %v764_v31 = vpop.permute.xlu0 %763 }
 0x2cc   :  { %1101 = vmatprep.subr.bf16.mxu1 %v567_v44 }
 0x2cf   :  { %1102 = vmatpush3.bf16.msra.mxu1 %v567_v44  ;;  %v907_v32 = vpop.permute.xlu1 %906  ;;  %v769_v33 = vpop.permute.xlu0 %768 }
 0x2d2   :  { %1104 = vmatmul.mubr.msk.bf16.vlgmr.msra.gmra.mrb[8].mxu1 %vm305_vm1, %v1145_v46 }
 0x2d3   :  { %1107 = vmatprep.mubr.msk.bf16.mxu1 %vm305_vm1, %v1146_v47  ;;  %v912_v35 = vpop.permute.xlu1 %911  ;;  %v774_v44 = vpop.permute.xlu0 %773 }
 0x2d7   :  { %v917_v47 = vpop.permute.xlu1 %916 }
 0x2da   :  { %1108 = vmatmul.mubr.msk.bf16.gmra.mrb[12].mxu1 %vm305_vm1, %v1147_v48 }
 0x3a5   :  { %v1105_v54 = vpop.f32.mrb[8].mxu1 }
 0x3a6   :  { %v691_v55 = vadd.f32 %v1105_v54, %v589_v52  ;;  %v682_v56 = vpop.f32.mrb[9].mxu1 }
 0x3a7   :  { %v683_v58 = vadd.f32 %v682_v56, %v579_v50  ;;  %v1106_v59 = vpop.f32.mrb[10].mxu1 }
 0x3a8   :  { %v694_v60 = vadd.f32 %v1106_v59, %v594_v53  ;;  %v685_v61 = vpop.f32.mrb[11].mxu1  ;;  %v715_v0 = vmax.f32 %v691_v55, 0.0 }
 0x3a9   :  { %v686_v63 = vadd.f32 %v685_v61, %v584_v51  ;;  %v713_v2 = vmax.f32 %v683_v58, 0.0  ;;  %v779_v58 = vpop.permute.xlu0 %778 }
 0x3aa   :  { %v716_v1 = vmax.f32 %v694_v60, 0.0 }
 0x3ab   :  { %v714_v3 = vmax.f32 %v686_v63, 0.0 }
 0x3ac   :  { %v730_v4 = vpack.c.bf16 %v716_v1, %v715_v0  ;;  %v922_v1 = vpop.permute.xlu1 %921 }
 0x3ad   :  { %v729_v6 = vpack.c.bf16 %v714_v3, %v713_v2  ;;  %v1109_v7 = vpop.f32.mrb[12].mxu1 }
 0x3ae   :  { %v707_v8 = vadd.f32 %v1109_v7, %v609_v5  ;;  %v698_v9 = vpop.f32.mrb[13].mxu1 }
 0x3af   :  { %v699_v11 = vadd.f32 %v698_v9, %v599_v57  ;;  %v1110_v12 = vpop.f32.mrb[14].mxu1  ;;  %1111 = vmatprep.subr.bf16.mxu0 %v729_v6  ;;  %v927_v9 = vpop.permute.xlu0 %926 }
 0x3b0   :  { %v710_v13 = vadd.f32 %v1110_v12, %v614_v10  ;;  %v701_v14 = vpop.f32.mrb[15].mxu1  ;;  %1112 = vmatpush3.bf16.msra.mxu0 %v729_v6  ;;  %v719_v16 = vmax.f32 %v707_v8, 0.0  ;;  %v932_v12 = vpop.permute.xlu1 %931 }
 0x3b1   :  { %v702_v15 = vadd.f32 %v701_v14, %v604_v62  ;;  %1113 = vmatprep.subr.bf16.mxu0 %v730_v4  ;;  %v717_v18 = vmax.f32 %v699_v11, 0.0 }
 0x3b2   :  { %v720_v17 = vmax.f32 %v710_v13, 0.0 }
 0x3b3   :  { %v718_v19 = vmax.f32 %v702_v15, 0.0  ;;  %v961_v15 = vlaneseq }
 0x3b4   :  { %v732_v20 = vpack.c.bf16 %v720_v17, %v719_v16  ;;  %1114 = vmatpush3.bf16.msra.mxu0 %v730_v4 }
 0x3b5   :  { %v731_v21 = vpack.c.bf16 %v718_v19, %v717_v18  ;;  %v962_v18 = vshrl.u32 %v961_v15, 7 }
 0x3b7   :  { %1115 = vmatprep.subr.bf16.mxu0 %v731_v21 }
 0x3b8   :  { %1116 = vmatpush3.bf16.msra.mxu0 %v731_v21  ;;  %v963_v21 = vsub.s32 0, %v962_v18 }
 0x3b9   :  { %1117 = vmatprep.subr.bf16.mxu0 %v732_v20 }
 0x3bc   :  { %1118 = vmatpush3.bf16.msra.mxu0 %v732_v20 }
 0x3bf   :  { %1120 = vmatmul.mubr.msk.bf16.vlgmr.msra.gmra.mrb[16].mxu0 %vm305_vm1, %v1149_v22 }
 0x3c0   :  { %1123 = vmatprep.mubr.msk.bf16.mxu0 %vm305_vm1, %v1150_v23  ;;  %v959_v23 = vpop.permute.xlu0 %958 }
 0x3c7   :  { %1124 = vmatmul.mubr.msk.bf16.gmra.mrb[20].mxu0 %vm305_vm1, %v1151_v24 }
 0x492   :  { %v1121_v34 = vpop.f32.mrb[16].mxu0 }
 0x493   :  { %v847_v36 = vpop.f32.mrb[17].mxu0  ;;  %v856_v37 = vadd.f32 %v1121_v34, %v754_v27 }
 0x494   :  { %v848_v38 = vadd.f32 %v847_v36, %v744_v25  ;;  %v1122_v39 = vpop.f32.mrb[18].mxu0  ;;  %v964_v25 = vrot.slane %v959_v23, %v963_v21 }
 0x495   :  { %v859_v40 = vadd.f32 %v1122_v39, %v759_v28  ;;  %v850_v41 = vpop.f32.mrb[19].mxu0  ;;  %v880_v45 = vmax.f32 %v856_v37, 0.0 }
 0x496   :  { %v878_v42 = vmax.f32 %v848_v38, 0.0  ;;  %v851_v43 = vadd.f32 %v850_v41, %v749_v26 }
 0x497   :  { %v881_v48 = vmax.f32 %v859_v40, 0.0  ;;  %v936_v53 = vmul.f32 %v907_v32, %v880_v45 }
 0x498   :  { %v879_v46 = vmax.f32 %v851_v43, 0.0  ;;  %v934_v49 = vmul.f32 %v897_v29, %v878_v42 }
 0x499   :  { %v937_v59 = vmul.f32 %v912_v35, %v881_v48 }
 0x49a   :  { %v935_v50 = vmul.f32 %v902_v30, %v879_v46  ;;  %v1125_v51 = vpop.f32.mrb[20].mxu0 }
 0x49b   :  { %v863_v52 = vpop.f32.mrb[21].mxu0  ;;  %v872_v55 = vadd.f32 %v1125_v51, %v774_v44 }
 0x49c   :  { %v942_v54 = vadd.f32 %v935_v50, %v934_v49  ;;  %v864_v56 = vadd.f32 %v863_v52, %v764_v31  ;;  %v1126_v57 = vpop.f32.mrb[22].mxu0 }
 0x49d   :  { %v866_v60 = vpop.f32.mrb[23].mxu0  ;;  %v875_v63 = vadd.f32 %v1126_v57, %v779_v58  ;;  %v884_v2 = vmax.f32 %v872_v55, 0.0 }
 0x49e   :  { %v943_v61 = vadd.f32 %v942_v54, %v936_v53  ;;  %v882_v62 = vmax.f32 %v864_v56, 0.0  ;;  %v867_v0 = vadd.f32 %v866_v60, %v769_v33 }
 0x49f   :  { %v885_v7 = vmax.f32 %v875_v63, 0.0  ;;  %v940_v10 = vmul.f32 %v927_v9, %v884_v2 }
 0x4a0   :  { %v938_v3 = vmul.f32 %v917_v47, %v882_v62  ;;  %v944_v4 = vadd.f32 %v943_v61, %v937_v59  ;;  %v883_v5 = vmax.f32 %v867_v0, 0.0 }
 0x4a1   :  { %v941_v13 = vmul.f32 %v932_v12, %v885_v7 }
 0x4a2   :  { %v945_v6 = vadd.f32 %v944_v4, %v938_v3  ;;  %v939_v8 = vmul.f32 %v922_v1, %v883_v5 }
 0x4a4   :  { %v946_v11 = vadd.f32 %v945_v6, %v939_v8 }
 0x4a6   :  { %v947_v14 = vadd.f32 %v946_v11, %v940_v10 }
 0x4a8   :  { %v948_v16 = vadd.f32 %v947_v14, %v941_v13 }
 0x4aa   :  { %v949_v17 = vrot.slane %v948_v16, 4 }
 0x4ac   :  { %v950_v19 = vadd.f32 %v949_v17, %v948_v16 }
 0x4ae   :  { %v951_v20 = vrot.slane %v950_v19, 2 }
 0x4b0   :  { %v952_v22 = vadd.f32 %v951_v20, %v950_v19 }
 0x4b2   :  { %v953_v24 = vrot.slane %v952_v22, 1 }
 0x4b4   :  { %v954_v26 = vadd.f32 %v953_v24, %v952_v22 }
 0x4b6   :  { %v965_v27 = vadd.f32 %v964_v25, %v954_v26 }
 0x4b8   :  { %966 = vst [vmem:[%s1472_s13] sm:$0x1] %v965_v27 }

</bundles_post_ra>
